<compile_context>
chip_gen: v5e
topology: v5e:2x2
jax: 0.10.0
libtpu: 0.0.40
codegen_flags: <defaults>
</compile_context>

<pallas_src>
import jax
import jax.numpy as jnp
from jax.experimental import pallas as pl
from jax.experimental.pallas import tpu as pltpu


def convtranspose_kernel(x_ref, w_ref, s_ref, b_ref, o_ref):
    # x_ref: (C, L)   activation tile, flattened spatial on the lane axis.
    # w_ref: (N, C)   resident transposed-conv weights, rows ordered (o, i, j).
    # s_ref: (N, 1)   per-row BN scale (f32), broadcast over lanes.
    # b_ref: (N, 1)   per-row folded BN bias (f32).
    # o_ref: (N, L)   output tile (lane-dense bf16 stores).
    acc = jnp.dot(w_ref[...], x_ref[...], preferred_element_type=jnp.float32)  # MXU
    y = acc * s_ref[...] + b_ref[...]                         # f32 BN epilogue (VPU)
    o_ref[...] = (y * jax.nn.sigmoid(y)).astype(o_ref.dtype)  # SiLU: EUP + VPU, cast on store


def _round_up(x, m):
    return (x + m - 1) // m * m


def _itemsize(dtype):
    return jnp.zeros((), dtype=dtype).dtype.itemsize


def _pick_spatial_tile(hw, c_in, n_out, in_isz, out_isz,
                       vmem_budget=20 << 20, max_l=4096):
    """Largest lane-dense (multiple-of-128) tile dividing hw that fits the VMEM budget."""
    if hw % 128 != 0:
        return hw  # small / unaligned spatial extents use one full-extent block
    per_col = 2 * (c_in * in_isz + n_out * out_isz)  # double-buffered input + output
    cap = int(min(max_l, max(128, vmem_budget // per_col)))
    for cand in range(cap - cap % 128, 127, -128):
        if hw % cand == 0:
            return cand
    return 128


def conv_transpose_forward(x, weight, gamma, beta, running_mean, running_var,
                           eps=1e-5, *, use_bf16=True, out_dtype=jnp.bfloat16):
    """SiLU(BN(ConvTranspose2d(k=2, s=2, p=0, bias=False)(x))).

    x:      (B, C, H, W) float32, NCHW.
    weight: (C, c2, 2, 2)  (PyTorch ConvTranspose2d layout).
    Returns (B, c2, 2H, 2W) in `out_dtype` (pass jnp.float32 to match PyTorch's dtype).
    """
    # TODO(synk): only the module defaults k=2, s=2, p=0 are implemented; general
    # strides/padding would need an overlapping-scatter formulation.
    B, C, H, W = x.shape
    c2 = weight.shape[1]
    assert weight.shape == (C, c2, 2, 2), f"unexpected weight shape {weight.shape}"
    HW = H * W
    N = 4 * c2

    in_dtype = jnp.bfloat16 if use_bf16 else jnp.float32
    inter_dtype = out_dtype  # pallas output dtype (bf16 by default: halves HBM writes)

    # ---- host-side prep: tiny channel-sized tensors only ----
    # weight rows ordered (o, i, j): w_mat[o*4 + i*2 + j, c] = weight[c, o, i, j]
    w_mat = jnp.transpose(weight, (1, 2, 3, 0)).reshape(N, C).astype(in_dtype)
    inv_std = jax.lax.rsqrt(running_var.astype(jnp.float32) + eps)
    scale = gamma.astype(jnp.float32) * inv_std                              # (c2,)
    bias = beta.astype(jnp.float32) - running_mean.astype(jnp.float32) * scale
    scale_col = jnp.repeat(scale, 4)[:, None]                                # (N, 1) f32
    bias_col = jnp.repeat(bias, 4)[:, None]                                  # (N, 1) f32

    # Activations stay channel-first; flattening H*W is a free reshape (no HBM copy).
    x_flat = x.reshape(B, C, HW).astype(in_dtype)

    # Pad the flat spatial dim to a multiple of 128 so stores stay lane-dense and
    # large non-aligned images still tile (the pad columns are sliced off below).
    HW_pad = HW if (HW <= 128 or HW % 128 == 0) else _round_up(HW, 128)
    if HW_pad != HW:
        x_flat = jnp.pad(x_flat, ((0, 0), (0, 0), (0, HW_pad - HW)))

    in_isz = _itemsize(in_dtype)
    out_isz = _itemsize(inter_dtype)
    L = _pick_spatial_tile(HW_pad, C, N, in_isz, out_isz)
    n_tiles = HW_pad // L
    # v7x megacore: keep at least 2 grid steps when the spatial extent allows it.
    while B * n_tiles < 2 and L % 256 == 0:
        L //= 2
        n_tiles = HW_pad // L

    # Resident weights: single-buffer when large (saves VMEM on v7x's 64 MiB).
    # TODO(synk): for very large N=4*c2, additionally block N with an extra grid axis.
    w_bytes = N * C * in_isz
    if w_bytes > (1 << 20):
        w_spec = pl.BlockSpec((N, C), lambda b, t: (0, 0), pipeline_mode=pl.Buffered(1))
    else:
        w_spec = pl.BlockSpec((N, C), lambda b, t: (0, 0))

    # VMEM accounting -> explicit limit (scoped defaults are only 16/32 MiB).
    est = 2 * L * (C * in_isz + N * out_isz) + 2 * w_bytes + 4 * N * 4
    vmem_limit = int(min(2 * est + (8 << 20), 56 << 20))

    # TODO(synk): if bundle dumps show exposed waits on the strided activation DMA
    # (small C), raise the activation spec to pipeline_mode=pl.Buffered(3).
    out_flat = pl.pallas_call(
        convtranspose_kernel,
        out_shape=jax.ShapeDtypeStruct((B, N, HW_pad), inter_dtype),
        grid=(B, n_tiles),
        in_specs=[
            pl.BlockSpec((None, C, L), lambda b, t: (b, 0, t)),   # streamed activations
            w_spec,                                               # resident weights
            pl.BlockSpec((N, 1), lambda b, t: (0, 0)),            # BN scale (f32)
            pl.BlockSpec((N, 1), lambda b, t: (0, 0)),            # BN bias (f32)
        ],
        out_specs=pl.BlockSpec((None, N, L), lambda b, t: (b, 0, t)),
        compiler_params=pltpu.CompilerParams(
            dimension_semantics=("parallel", "parallel"),
            vmem_limit_bytes=vmem_limit),
    )(x_flat, w_mat, scale_col, bias_col)

    if HW_pad != HW:
        out_flat = out_flat[:, :, :HW]  # fuses into the depth-to-space pass below

    # depth-to-space (bf16): (B, c2, 2, 2, H, W) -> (B, c2, H, 2, W, 2) -> (B, c2, 2H, 2W)
    # TODO(synk): fuse this 2x2 pixel shuffle into the kernel epilogue (the width/j lane
    # interleave via packed 2xbf16 stores) to remove the remaining extra HBM pass.
    out = out_flat.reshape(B, c2, 2, 2, H, W).transpose(0, 1, 4, 2, 5, 3)
    return out.reshape(B, c2, 2 * H, 2 * W)


def _reference(x, weight, gamma, beta, running_mean, running_var, eps=1e-5):
    """Pure-JAX f32 reference: ConvTranspose2d(k=2,s=2,p=0,bias=False) + BN(eval) + SiLU."""
    B, C, H, W = x.shape
    c2 = weight.shape[1]
    y = jnp.einsum("bchw,coij->boijhw", x, weight)
    y = jnp.transpose(y, (0, 1, 4, 2, 5, 3)).reshape(B, c2, 2 * H, 2 * W)
    inv_std = 1.0 / jnp.sqrt(running_var + eps)
    y = (y - running_mean[None, :, None, None]) * (gamma * inv_std)[None, :, None, None] \
        + beta[None, :, None, None]
    return y * jax.nn.sigmoid(y)


if __name__ == "__main__":
    key = jax.random.PRNGKey(0)
    B, C, H, W = 2, 4, 16, 16   # input (b, c1, h, w)
    c2 = 8                      # ConvTranspose(c1=4, c2=8) with default k=2, s=2, p=0

    k_x, k_w, k_g, k_b, k_m, k_v = jax.random.split(key, 6)
    x = jax.random.normal(k_x, (B, C, H, W), dtype=jnp.float32)
    # PyTorch ConvTranspose2d weight layout: (in_channels, out_channels, kH, kW)
    weight = jax.random.normal(k_w, (C, c2, 2, 2), dtype=jnp.float32) * 0.1
    gamma = jax.random.uniform(k_g, (c2,), minval=0.5, maxval=1.5, dtype=jnp.float32)
    beta = jax.random.normal(k_b, (c2,), dtype=jnp.float32) * 0.1
    running_mean = jax.random.normal(k_m, (c2,), dtype=jnp.float32) * 0.1
    running_var = jax.random.uniform(k_v, (c2,), minval=0.5, maxval=1.5, dtype=jnp.float32)

    out = conv_transpose_forward(x, weight, gamma, beta, running_mean, running_var)
    out = jax.block_until_ready(out)

    ref = _reference(x, weight, gamma, beta, running_mean, running_var)
    assert out.shape == (B, c2, 2 * H, 2 * W), f"bad shape {out.shape}"
    out_f32 = out.astype(jnp.float32)
    # bf16 matmul inputs + bf16 output (f32 accumulation/epilogue) vs f32 reference.
    err = float(jnp.max(jnp.abs(out_f32 - ref)))
    assert jnp.allclose(out_f32, ref, atol=2e-2, rtol=2e-2), f"mismatch vs reference (max abs err {err})"

    print("KERNEL_OK")
</pallas_src>

<mosaic_0001>
module attributes {stable_mosaic.version = 11 : i64} {
  func.func @convtranspose_kernel(%arg0: i32, %arg1: i32, %arg2: memref<1x4x256xbf16, #tpu.memory_space<vmem>>, %arg3: memref<32x4xbf16, #tpu.memory_space<vmem>>, %arg4: memref<32x1xf32, #tpu.memory_space<vmem>>, %arg5: memref<32x1xf32, #tpu.memory_space<vmem>>, %arg6: memref<1x32x256xbf16, #tpu.memory_space<vmem>>) attributes {dimension_semantics = [#tpu.dimension_semantics<parallel>, #tpu.dimension_semantics<parallel>], iteration_bounds = array<i64: 2, 1>, scalar_prefetch = 0 : i64, scratch_operands = 0 : i64, tpu.core_type = #tpu.core_type<tc>, window_params = [{transform_indices = @transform_0, window_bounds = array<i64: 1, 4, 256>}, {pipeline_mode = #tpu.pipeline_mode<synchronous>, transform_indices = @transform_1, window_bounds = array<i64: 32, 4>}, {pipeline_mode = #tpu.pipeline_mode<synchronous>, transform_indices = @transform_2, window_bounds = array<i64: 32, 1>}, {pipeline_mode = #tpu.pipeline_mode<synchronous>, transform_indices = @transform_3, window_bounds = array<i64: 32, 1>}, {transform_indices = @transform_4, window_bounds = array<i64: 1, 32, 256>}]} {
    %c0 = arith.constant 0 : index
    %c0_0 = arith.constant 0 : index
    %0 = vector.load %arg3[%c0, %c0_0] : memref<32x4xbf16, #tpu.memory_space<vmem>>, vector<32x4xbf16>
    %c0_1 = arith.constant 0 : index
    %c0_2 = arith.constant 0 : index
    %c0_3 = arith.constant 0 : index
    %1 = vector.load %arg2[%c0_1, %c0_2, %c0_3] : memref<1x4x256xbf16, #tpu.memory_space<vmem>>, vector<1x4x256xbf16>
    %2 = vector.shape_cast %1 : vector<1x4x256xbf16> to vector<4x256xbf16>
    %cst = arith.constant dense<0.000000e+00> : vector<32x256xf32>
    %3 = tpu.matmul %0, %2, %cst {dimension_numbers = #tpu.dot_dimension_numbers<[1], [0], [0], [1], [0, 0, 1, 1], [], []>} : vector<32x4xbf16>, vector<4x256xbf16>, vector<32x256xf32> -> vector<32x256xf32>
    %c0_4 = arith.constant 0 : index
    %c0_5 = arith.constant 0 : index
    %4 = vector.load %arg4[%c0_4, %c0_5] : memref<32x1xf32, #tpu.memory_space<vmem>>, vector<32x1xf32>
    %5 = vector.broadcast %4 : vector<32x1xf32> to vector<32x256xf32>
    %6 = arith.mulf %3, %5 : vector<32x256xf32>
    %c0_6 = arith.constant 0 : index
    %c0_7 = arith.constant 0 : index
    %7 = vector.load %arg5[%c0_6, %c0_7] : memref<32x1xf32, #tpu.memory_space<vmem>>, vector<32x1xf32>
    %8 = vector.broadcast %7 : vector<32x1xf32> to vector<32x256xf32>
    %9 = arith.addf %6, %8 : vector<32x256xf32>
    %10 = arith.negf %9 : vector<32x256xf32>
    %11 = math.exp %10 : vector<32x256xf32>
    %cst_8 = arith.constant 1.000000e+00 : f32
    %12 = vector.broadcast %cst_8 : f32 to vector<32x256xf32>
    %13 = arith.addf %12, %11 : vector<32x256xf32>
    %14 = arith.divf %12, %13 : vector<32x256xf32>
    %15 = arith.mulf %9, %14 : vector<32x256xf32>
    %16 = arith.truncf %15 : vector<32x256xf32> to vector<32x256xbf16>
    %c0_9 = arith.constant 0 : index
    %c0_10 = arith.constant 0 : index
    %c0_11 = arith.constant 0 : index
    %17 = vector.load %arg6[%c0_9, %c0_10, %c0_11] : memref<1x32x256xbf16, #tpu.memory_space<vmem>>, vector<1x32x256xbf16>
    %18 = vector.shape_cast %17 : vector<1x32x256xbf16> to vector<32x256xbf16>
    %19 = vector.shape_cast %16 : vector<32x256xbf16> to vector<1x32x256xbf16>
    tpu.vector_store %arg6[%c0_9, %c0_10, %c0_11], %19 {strides = array<i32>} : memref<1x32x256xbf16, #tpu.memory_space<vmem>>, vector<1x32x256xbf16>,
    return
  }
  func.func @transform_0(%arg0: i32, %arg1: i32) -> (i32, i32, i32) {
    %c0_i32 = arith.constant 0 : i32
    %c0_i32_0 = arith.constant 0 : i32
    return %arg0, %c0_i32, %arg1 : i32, i32, i32
  }
  func.func @transform_1(%arg0: i32, %arg1: i32) -> (i32, i32) {
    %c0_i32 = arith.constant 0 : i32
    %c0_i32_0 = arith.constant 0 : i32
    %c0_i32_1 = arith.constant 0 : i32
    return %c0_i32, %c0_i32_0 : i32, i32
  }
  func.func @transform_2(%arg0: i32, %arg1: i32) -> (i32, i32) {
    %c0_i32 = arith.constant 0 : i32
    %c0_i32_0 = arith.constant 0 : i32
    %c0_i32_1 = arith.constant 0 : i32
    return %c0_i32, %c0_i32_0 : i32, i32
  }
  func.func @transform_3(%arg0: i32, %arg1: i32) -> (i32, i32) {
    %c0_i32 = arith.constant 0 : i32
    %c0_i32_0 = arith.constant 0 : i32
    %c0_i32_1 = arith.constant 0 : i32
    return %c0_i32, %c0_i32_0 : i32, i32
  }
  func.func @transform_4(%arg0: i32, %arg1: i32) -> (i32, i32, i32) {
    %c0_i32 = arith.constant 0 : i32
    %c0_i32_0 = arith.constant 0 : i32
    return %arg0, %c0_i32, %arg1 : i32, i32, i32
  }
}

</mosaic_0001>

<bundles_post_ra>
// kernel: tpu_custom_call.1
= control target key start
LH: loop header
LB: loop body
LE: loop exit
PB: predicated region body
PF: predicated region fallthrough
CT: control target
= control target key end

     0   :  { %9 = vsyncpa [#allocation3], 0  ;;  %s1115_s0 = inlined_call_operand.vmem [shape: bf16[2,4,256], index: 0, kind: input, shape index: {}]   ;;  %s1116_s1 = inlined_call_operand.vmem [shape: bf16[32,4], index: 1, kind: input, shape index: {}]   ;;  %s1117_s2 = inlined_call_operand.vmem [shape: f32[32,1], index: 2, kind: input, shape index: {}]   ;;  %s1118_s3 = inlined_call_operand.vmem [shape: f32[32,1], index: 3, kind: input, shape index: {}]   ;;  %s1119_s4 = inlined_call_operand.hbm [shape: bf16[2,32,256], index: 4, kind: output, shape index: {}]  }
   0x1   :  { %11 = vsyncpa [#allocation3 + $0x1], 0  ;;  %s866_s15 = smov 0   ;;  %s868_s16 = smov 0  }
   0x2   :  { %s870_s17 = smov 0   ;;  %s872_s18 = smov 0  }
   0x3   :  { %s874_s19 = smov 0   ;;  %s876_s20 = smov 0  }
   0x4 LB: > { %s626_s21 = sadd.s32 4294967295, %s836_s20   ;;  %s627_s22 = sadd.s32 4294967294, %s836_s20   ;;  %s836_s20 = sphi %s876_s20, %s17_s20   ;;  %s832_s19 = sphi %s874_s19, %s1134_s19   ;;  %s828_s18 = sphi %s872_s18, %s1133_s18   ;;  %s824_s17 = sphi %s870_s17, %s1132_s17   ;;  %s820_s16 = sphi %s868_s16, %s1131_s16   ;;  %s816_s15 = sphi %s866_s15, %s1130_s15  }
   0x5   : > { %s29_s23 = sadd.s32 1, %s832_s19  ;;  %s129_s24 = sadd.s32 1, %s824_s17 }
   0x6   : > { %p31_p0 = scmp.ge.s32.totalorder %s29_s23, 2  ;;  %p139_p1 = scmp.ne.s32.totalorder %s824_s17, %s820_s16 }
   0x7   : > { %p140_p2 = scmp.eq.s32.totalorder %s626_s21, 1  ;;  %p145_p3 = scmp.ne.s32.totalorder %s820_s16, %s816_s15 }
   0x8   : > { %s1136_s23 = smov (%p31_p0, %s29_s23), 0  ;;  %p146_p5 = scmp.eq.s32.totalorder %s627_s22, 1 }
   0x9   : > { %p906_p4 = por %p140_p2, %p139_p1  ;;  %s124_s26 = ssub.s32 %s832_s19, %s1136_s23 }
   0xa   : > { %p630_p6 = scmp.ge.s32.totalorder %s836_s20, 1  ;;  %p127_p7 = scmp.eq.s32.totalorder %s124_s26, 0 }
   0xb   : > { %p913_p8 = por %p146_p5, %p145_p3  ;;  %p186_p9 = scmp.lt.s32.totalorder %s836_s20, 3 }
   0xc   : > { %s919_s28 = scalar_select %p127_p7, %s824_s17, %s129_s24  }
   0xd   : > { %p187_p10 = pnand %p630_p6, %p186_p9 }
   0xe   : > { %p217_p11 = scmp.lt.s32.totalorder (!%p187_p10), %s828_s18, 1  ;;  %s213_s12 = sand.u32 (!%p187_p10), 1, %s820_s16  }
   0xf   : > { %190 = sbr.rel (%p187_p10) target bundleno = 234 (0xea), region = 36  ;;  %s662_s21 = sshll.u32 (!%p187_p10), %s828_s18, 5 }
  0x10   : > { %s543_s26 = scalar_lea.hbm (!%p187_p10), %s1119_s4, %s662_s21  ;;  %s530_s30 = scalar_lea.sflag (!%p187_p10), [#allocation3], %s213_s12 }
  0x11   : > { %s546_s29 = sshll.u32 (!%p187_p10), %s543_s26, 4  ;;  %s778_s9 = scalar_lea.hbm (!%p187_p10), %s1119_s4, 64  ;;  %s547_s29 = int_to_ptr.hbm [resolvable:$true] %s546_s29 }
  0x12   : > { %s772_s5 = sshra.s32 (!%p187_p10), %s547_s29, 4  ;;  %s773_s5 = int_to_ptr.hbm [resolvable:$true] %s772_s5 }
  0x13   : > { %s774_s6 = scalar_lea.hbm (!%p187_p10), %s773_s5, 32  ;;  %p779_p1 = scmp.lt.s32.totalorder (!%p187_p10), %s773_s5, %s1119_s4 }
  0x14   : > { %v299_v0 = vld [vmem:[%s1117_s2 + $0x10] sm:$0xff]  ;;  %v297_v1 = vld [vmem:[%s1117_s2] sm:$0xff]  ;;  %v838_v2 = vmov 0   ;;  %s218_s7 = scalar_select %p217_p11, %s828_s18, 1  ;;  %v300_v5 = vld [vmem:[%s1117_s2 + $0x18] sm:$0xff]  ;;  %vm254_vm0 = vcmask 1041408  }
  0x15   : > { %724 = vset.pattern.permute.xlu1 %v838_v2  ;;  %723 = vset.pattern.permute.xlu0 %v838_v2  ;;  %v329_v3 = vld [vmem:[%s1118_s3] sm:$0xff]  ;;  %v298_v6 = vld [vmem:[%s1117_s2 + $0x8] sm:$0xff]  ;;  %v332_v14 = vld [vmem:[%s1118_s3 + $0x18] sm:$0xff]  ;;  %vm247_vm1 = vcmask 31744   ;;  %p775_p12 = scmp.ne.s32.totalorder %s773_s5, %s774_s6  ;;  %p780_p2 = scmp.lt.s32.totalorder %s778_s9, %s774_s6 }
  0x16   : > { %313 = vperm.xlu1 %724, %v299_v0   ;;  %303 = vperm.xlu0 %723, %v297_v1   ;;  %s659_s10 = sshll.u32 %s218_s7, 2  ;;  %v330_v7 = vld [vmem:[%s1118_s3 + $0x8] sm:$0xff]  ;;  %v660_v8 = vld [vmem:[%s1116_s1] sm:$0xff]  ;;  %v331_v15 = vld [vmem:[%s1118_s3 + $0x10] sm:$0xff] }
  0x17   : > { %725 = vset.pattern.permute.xlu2 %v838_v2  ;;  %s224_s13 = scalar_lea.vmem %s1115_s0, %s659_s10  ;;  %v661_v13 = vld [vmem:[%s1116_s1 + $0x8] sm:$0xff]  ;;  %p776_p13 = pnand %p775_p12, %p906_p4 }
  0x18   : > { %335 = vperm.xlu2 %725, %v329_v3   ;;  %v232_v4 = vld [vmem:[%s224_s13] sm:$0xf]  ;;  %s631_s13 = sshll.u32 %s213_s12, 5  ;;  %p781_p3 = por %p780_p2, %p779_p1 }
  0x19   : > { %244 = vst [vmem:[#allocation1] ss:$4 sm:$0xff] %v232_v4  ;;  %s1050_s14 = scalar_lea.vmem [#allocation2], %s631_s13  ;;  %p777_p0 = pneg %p776_p13 }
  0x1a   : > { %s544_s18 = sshll.u32 %s1050_s14, 4  ;;  %s545_s18 = int_to_ptr.vmem [resolvable:$true] %s544_s18 }
  0x1b   : > { %p782_p5 = pnand %p781_p3, %p777_p0 }
  0x1e   : > { %318 = vperm.xlu1 %724, %v300_v5   ;;  %308 = vperm.xlu0 %723, %v298_v6  }
  0x20   : > { %340 = vperm.xlu2 %725, %v330_v7   ;;  %v245_v9 = vld.sshfl [vmem:[#allocation1] sm:$0xff pattern:$0x73625140]  ;;  %v246_v10 = vld.sshfl [vmem:[#allocation1 + $0x8] sm:$0xff pattern:$0x73625140] }
  0x21   : > { %v255_v11 = vsel %vm254_vm0, %v245_v9, 0  ;;  %v257_v12 = vsel %vm254_vm0, %v246_v10, 0 }
  0x22   : > { %266 = vmatpush.bf16.msra.mxu0 %v255_v11  ;;  %663 = vmatpush.bf16.msra.mxu2 %v255_v11 }
  0x23   : > { %285 = vmatpush.bf16.msra.mxu1 %v257_v12  ;;  %664 = vmatpush.bf16.msra.mxu3 %v257_v12 }
  0x25   : > { %642 = vmatmul.msk.bf16.vlgmr.msra.gmra.mxu0 %vm247_vm1, %v660_v8  ;;  %643 = vmatmul.msk.bf16.vlgmr.msra.gmra.mxu2 %vm247_vm1, %v661_v13 }
  0x26   : > { %350 = vperm.xlu1 %724, %v332_v14   ;;  %345 = vperm.xlu0 %723, %v331_v15  }
  0x27   : > { %644 = vmatmul.msk.bf16.vlgmr.msra.gmra.mxu1 %vm247_vm1, %v660_v8  ;;  %645 = vmatmul.msk.bf16.vlgmr.msra.gmra.mxu3 %vm247_vm1, %v661_v13 }
  0x72   : > { %v336_v19 = vpop.permute.xlu2 %335 }
  0x7a   : > { %v341_v39 = vpop.permute.xlu2 %340 }
  0x88   : > { %v304_v16 = vpop.permute.xlu0 %303  ;;  %v314_v17 = vpop.permute.xlu1 %313 }
  0x90   : > { %v309_v18 = vpop.permute.xlu0 %308  ;;  %v319_v29 = vpop.permute.xlu1 %318 }
  0x98   : > { %v346_v32 = vpop.permute.xlu0 %345  ;;  %v351_v53 = vpop.permute.xlu1 %350 }
  0xa2   : > { %v268_v20 = vpop.f32.mrf.mxu0 }
  0xa3   : > { %v321_v21 = vmul.f32 %v304_v16, %v268_v20 }
  0xa4   : > { %v287_v22 = vpop.f32.mrf.mxu1 }
  0xa5   : > { %v322_v23 = vmul.f32 %v304_v16, %v287_v22  ;;  %v956_v24 = vadd.f32 %v336_v19, %v321_v21 }
  0xa7   : > { %v958_v25 = vadd.f32 %v336_v19, %v322_v23  ;;  %v646_v26 = vmul.f32 -1.442695, %v956_v24 }
  0xa8   : > { %v273_v28 = vpop.f32.mrf.mxu2 }
  0xa9   : > { %v647_v27 = vmul.f32 -1.442695, %v958_v25  ;;  %726 = vpow2.f32 %v646_v26  ;;  %v325_v30 = vmul.f32 %v314_v17, %v273_v28 }
  0xaa   : > { %v292_v31 = vpop.f32.mrf.mxu3  ;;  %v270_v34 = vpop.f32.mrf.mxu0 }
  0xab   : > { %728 = vpow2.f32 %v647_v27  ;;  %v326_v33 = vmul.f32 %v314_v17, %v292_v31  ;;  %v962_v35 = vadd.f32 %v346_v32, %v325_v30  ;;  %v323_v36 = vmul.f32 %v309_v18, %v270_v34 }
  0xac   : > { %v289_v37 = vpop.f32.mrf.mxu1 }
  0xad   : > { %v964_v38 = vadd.f32 %v346_v32, %v326_v33  ;;  %v324_v40 = vmul.f32 %v309_v18, %v289_v37  ;;  %v650_v41 = vmul.f32 -1.442695, %v962_v35  ;;  %v967_v42 = vadd.f32 %v341_v39, %v323_v36 }
  0xaf   : > { %v651_v43 = vmul.f32 -1.442695, %v964_v38  ;;  %v970_v44 = vadd.f32 %v341_v39, %v324_v40  ;;  %v727_v45 = vpop.eup %726  ;;  %730 = vpow2.f32 %v650_v41  ;;  %v648_v46 = vmul.f32 -1.442695, %v967_v42 }
  0xb0   : > { %v385_v48 = vadd.f32 1.0, %v727_v45  ;;  %v275_v50 = vpop.f32.mrf.mxu2 }
  0xb1   : > { %v729_v47 = vpop.eup %728  ;;  %732 = vpow2.f32 %v651_v43  ;;  %v649_v49 = vmul.f32 -1.442695, %v970_v44  ;;  %v327_v52 = vmul.f32 %v319_v29, %v275_v50 }
  0xb2   : > { %v974_v51 = vadd.f32 1.0, %v729_v47  ;;  %734 = vpow2.f32 %v648_v46  ;;  %v294_v54 = vpop.f32.mrf.mxu3  ;;  %v402_v57 = vand.u32 2147483647, %v385_v48  ;;  %v404_v58 = vand.u32 2147483648, %v385_v48 }
  0xb3   : > { %736 = vrcp.f32 %v385_v48  ;;  %v977_v55 = vadd.f32 %v351_v53, %v327_v52  ;;  %v328_v63 = vmul.f32 %v319_v29, %v294_v54  ;;  %vm398_vm2 = vweird.f32 %v385_v48 }
  0xb4   : > { %738 = vrcp.f32 %v974_v51  ;;  %v417_v60 = vand.u32 2147483647, %v974_v51  ;;  %v419_v61 = vand.u32 2147483648, %v974_v51  ;;  %vm413_vm3 = vweird.f32 %v974_v51 }
  0xb5   : > { %740 = vpow2.f32 %v649_v49  ;;  %v731_v56 = vpop.eup %730  ;;  %v652_v3 = vmul.f32 -1.442695, %v977_v55  ;;  %vm988_vm4 = vcmp.eq.f32.partialorder %v402_v57, 8.507059e+37  ;;  %v405_v7 = vor.u32 1.1754944e-38, %v404_v58 }
  0xb6   : > { %v981_v62 = vadd.f32 1.0, %v731_v56  ;;  %vm994_vm5 = vcmp.eq.f32.partialorder %v417_v60, 8.507059e+37  ;;  %v420_v11 = vor.u32 1.1754944e-38, %v419_v61  ;;  %v998_v12 = vadd.f32 %v351_v53, %v328_v63 }
  0xb7   : > { %v733_v59 = vpop.eup %732 }
  0xb8   : > { %v735_v0 = vpop.eup %734  ;;  %v983_v1 = vadd.f32 1.0, %v733_v59  ;;  %742 = vrcp.f32 %v981_v62  ;;  %v462_v14 = vand.u32 2147483647, %v981_v62  ;;  %v464_v15 = vand.u32 2147483648, %v981_v62 }
  0xb9   : > { %v737_v2 = vpop.eup %736  ;;  %v1002_v16 = vadd.f32 1.0, %v735_v0  ;;  %vm458_vm8 = vweird.f32 %v981_v62  ;;  %v653_v33 = vmul.f32 -1.442695, %v998_v12 }
  0xba   : > { %v739_v4 = vpop.eup %738  ;;  %v394_v5 = vmul.f32 %v737_v2, %v385_v48  ;;  %744 = vrcp.f32 %v983_v1  ;;  %vm399_vm6 = vweird.f32 %v737_v2  ;;  %v477_v20 = vand.u32 2147483647, %v983_v1 }
  0xbb   : > { %v741_v8 = vpop.eup %740  ;;  %v409_v9 = vmul.f32 %v739_v4, %v974_v51  ;;  %746 = vpow2.f32 %v652_v3  ;;  %v479_v21 = vand.u32 2147483648, %v983_v1  ;;  %vm414_vm7 = vweird.f32 %v739_v4  ;;  %vm400_vm11 = vmor %vm398_vm2, %vm399_vm6 }
  0xbc   : > { %v395_v13 = vsub.f32 1.0, %v394_v5  ;;  %v1004_v18 = vadd.f32 1.0, %v741_v8  ;;  %748 = vrcp.f32 %v1002_v16  ;;  %vm473_vm9 = vweird.f32 %v983_v1  ;;  %vm415_vm12 = vmor %vm413_vm3, %vm414_vm7 }
  0xbd   : > { %v410_v17 = vsub.f32 1.0, %v409_v9  ;;  %vm1013_vm10 = vcmp.eq.f32.partialorder %v462_v14, 8.507059e+37  ;;  %v465_v31 = vor.u32 1.1754944e-38, %v464_v15  ;;  %vm1025_vm13 = vcmp.eq.f32.partialorder %v477_v20, 8.507059e+37 }
  0xbe   : > { %v396_v19 = vmul.f32 %v737_v2, %v395_v13  ;;  %v743_v22 = vpop.eup %742  ;;  %750 = vrcp.f32 %v1004_v18  ;;  %v480_v39 = vor.u32 1.1754944e-38, %v479_v21  ;;  %vm428_vm14 = vweird.f32 %v1002_v16 }
  0xbf   : > { %v411_v23 = vmul.f32 %v739_v4, %v410_v17  ;;  %v454_v28 = vmul.f32 %v743_v22, %v981_v62  ;;  %vm459_vm15 = vweird.f32 %v743_v22  ;;  %v432_v56 = vand.u32 2147483647, %v1002_v16 }
  0xc0   : > { %v745_v26 = vpop.eup %744  ;;  %v397_v27 = vadd.f32 %v737_v2, %v396_v19  ;;  %v434_v57 = vand.u32 2147483648, %v1002_v16  ;;  %vm460_vm1 = vmor %vm458_vm8, %vm459_vm15  ;;  %v447_v63 = vand.u32 2147483647, %v1004_v18  ;;  %v449_v5 = vand.u32 2147483648, %v1004_v18 }
  0xc1   : > { %v412_v30 = vadd.f32 %v739_v4, %v411_v23  ;;  %v469_v32 = vmul.f32 %v745_v26, %v983_v1  ;;  %v455_v36 = vsub.f32 1.0, %v454_v28  ;;  %v747_v40 = vpop.eup %746  ;;  %vm474_vm0 = vweird.f32 %v745_v26 }
  0xc2   : > { %v401_v34 = vsel %vm400_vm11, %v737_v2, %v397_v27  ;;  %v749_v46 = vpop.eup %748  ;;  %v1041_v58 = vadd.f32 1.0, %v747_v40  ;;  %vm475_vm2 = vmor %vm473_vm9, %vm474_vm0  ;;  %vm433_vm6 = vcmp.eq.f32.partialorder %v432_v56, 8.507059e+37  ;;  %v435_v9 = vor.u32 1.1754944e-38, %v434_v57 }
  0xc3   : > { %v406_v41 = vsel %vm988_vm4, %v405_v7, %v401_v34  ;;  %v416_v43 = vsel %vm415_vm12, %v739_v4, %v412_v30  ;;  %v470_v45 = vsub.f32 1.0, %v469_v32  ;;  %v456_v49 = vmul.f32 %v743_v22, %v455_v36 }
  0xc4   : > { %v513_v47 = vmul.f32 %v406_v41, %v956_v24  ;;  %v421_v48 = vsel %vm994_vm5, %v420_v11, %v416_v43  ;;  %v424_v52 = vmul.f32 %v749_v46, %v1002_v16  ;;  %v751_v53 = vpop.eup %750  ;;  %vm429_vm3 = vweird.f32 %v749_v46 }
  0xc5   : > { %v514_v50 = vmul.f32 %v421_v48, %v958_v25  ;;  %v471_v51 = vmul.f32 %v745_v26, %v470_v45  ;;  %v457_v54 = vadd.f32 %v743_v22, %v456_v49  ;;  %v439_v25 = vmul.f32 %v751_v53, %v1004_v18  ;;  %vm430_vm5 = vmor %vm428_vm14, %vm429_vm3 }
  0xc6   : > { %v425_v60 = vsub.f32 1.0, %v424_v52  ;;  %752 = vrcp.f32 %v1041_v58  ;;  %vm444_vm4 = vweird.f32 %v751_v53  ;;  %vm443_vm7 = vweird.f32 %v1004_v18 }
  0xc7   : > { %v521_v24 = vpack.c.bf16 %v514_v50, %v513_v47  ;;  %v472_v59 = vadd.f32 %v745_v26, %v471_v51  ;;  %v461_v61 = vsel %vm460_vm1, %v743_v22, %v457_v54  ;;  %v440_v3 = vsub.f32 1.0, %v439_v25  ;;  %vm445_vm8 = vmor %vm443_vm7, %vm444_vm4 }
  0xc8   : > { %v466_v62 = vsel %vm1013_vm10, %v465_v31, %v461_v61  ;;  %v426_v2 = vmul.f32 %v749_v46, %v425_v60  ;;  %754 = vpow2.f32 %v653_v33  ;;  %vm448_vm9 = vcmp.eq.f32.partialorder %v447_v63, 8.507059e+37 }
  0xc9   : > { %525 = vst [vmem:[%s1050_s14] sm:$0xff] %v521_v24  ;;  %v476_v0 = vsel %vm475_vm2, %v745_v26, %v472_v59  ;;  %v517_v4 = vmul.f32 %v466_v62, %v962_v35  ;;  %v441_v8 = vmul.f32 %v751_v53, %v440_v3  ;;  %vm488_vm11 = vweird.f32 %v1041_v58 }
  0xca   : > { %v481_v1 = vsel %vm1025_vm13, %v480_v39, %v476_v0  ;;  %v427_v7 = vadd.f32 %v749_v46, %v426_v2  ;;  %v492_v29 = vand.u32 2147483647, %v1041_v58 }
  0xcb   : > { %v518_v6 = vmul.f32 %v481_v1, %v964_v38  ;;  %v442_v11 = vadd.f32 %v751_v53, %v441_v8  ;;  %v450_v38 = vor.u32 1.1754944e-38, %v449_v5 }
  0xcc   : > { %v431_v35 = vsel %vm430_vm5, %v749_v46, %v427_v7  ;;  %v753_v13 = vpop.eup %752  ;;  %vm493_vm13 = vcmp.eq.f32.partialorder %v492_v29, 8.507059e+37 }
  0xcd   : > { %v523_v10 = vpack.c.bf16 %v518_v6, %v517_v4  ;;  %v436_v14 = vsel %vm433_vm6, %v435_v9, %v431_v35  ;;  %v446_v17 = vsel %vm445_vm8, %v751_v53, %v442_v11  ;;  %v484_v16 = vmul.f32 %v753_v13, %v1041_v58 }
  0xce   : > { %v515_v15 = vmul.f32 %v436_v14, %v967_v42  ;;  %v451_v19 = vsel %vm448_vm9, %v450_v38, %v446_v17  ;;  %v755_v20 = vpop.eup %754  ;;  %vm489_vm10 = vweird.f32 %v753_v13  ;;  %v494_v42 = vand.u32 2147483648, %v1041_v58 }
  0xcf   : > { %527 = vst [vmem:[%s1050_s14 + $0x10] sm:$0xff] %v523_v10  ;;  %v516_v21 = vmul.f32 %v451_v19, %v970_v44  ;;  %v485_v22 = vsub.f32 1.0, %v484_v16  ;;  %v392_v18 = vadd.f32 1.0, %v755_v20  ;;  %vm490_vm12 = vmor %vm488_vm11, %vm489_vm10 }
  0xd0   : > { %v495_v32 = vor.u32 1.1754944e-38, %v494_v42 }
  0xd1   : > { %v522_v23 = vpack.c.bf16 %v516_v21, %v515_v15  ;;  %756 = vrcp.f32 %v392_v18  ;;  %v486_v26 = vmul.f32 %v753_v13, %v485_v22  ;;  %v509_v33 = vand.u32 2147483648, %v392_v18 }
  0xd2   : > { %v507_v36 = vand.u32 2147483647, %v392_v18  ;;  %vm503_vm15 = vweird.f32 %v392_v18 }
  0xd3   : > { %526 = vst [vmem:[%s1050_s14 + $0x8] sm:$0xff] %v522_v23  ;;  %v487_v27 = vadd.f32 %v753_v13, %v486_v26  ;;  %v510_v40 = vor.u32 1.1754944e-38, %v509_v33 }
  0xd4   : > { %vm508_vm1 = vcmp.eq.f32.partialorder %v507_v36, 8.507059e+37 }
  0xd5   : > { %v491_v31 = vsel %vm490_vm12, %v753_v13, %v487_v27 }
  0xd6   : > { %v496_v37 = vsel %vm493_vm13, %v495_v32, %v491_v31 }
  0xd7   : > { %v757_v28 = vpop.eup %756  ;;  %v519_v41 = vmul.f32 %v496_v37, %v977_v55 }
  0xd8   : > { %v499_v30 = vmul.f32 %v757_v28, %v392_v18  ;;  %vm504_vm14 = vweird.f32 %v757_v28 }
  0xd9   : > { %vm505_vm0 = vmor %vm503_vm15, %vm504_vm14 }
  0xda   : > { %v500_v44 = vsub.f32 1.0, %v499_v30 }
  0xdc   : > { %v501_v34 = vmul.f32 %v757_v28, %v500_v44 }
  0xde   : > { %v502_v39 = vadd.f32 %v757_v28, %v501_v34 }
  0xe0   : > { %v506_v43 = vsel %vm505_vm0, %v757_v28, %v502_v39 }
  0xe1   : > { %v511_v45 = vsel %vm508_vm1, %v510_v40, %v506_v43 }
  0xe2   : > { %v520_v46 = vmul.f32 %v511_v45, %v998_v12 }
  0xe4   : > { %v524_v47 = vpack.c.bf16 %v520_v46, %v519_v41 }
  0xe6   : > { %528 = vst [vmem:[%s1050_s14 + $0x18] sm:$0xff] %v524_v47 }
  0xe7   : > { %785 = shalt.err (!%p782_p5)
}
  0xe8   : > { %s839_s12 = smov 128   ;;  %s840_s13 = smov 8  }
  0xe9   : > { %665 = dma.vmem_to_hbm [thread:$0]  (%p906_p4), %s545_s18, 512, %s547_s29, %s530_s30, %s839_s12, %s839_s12, %s840_s13  }
  0xea PF: > { %p671_p6 = scmp.ge.s32.totalorder %s836_s20, 2  ;;  %s561_s14 = sand.u32 1, %s816_s15  }
  0xeb   : > { %s562_s21 = scalar_lea.sflag [#allocation3], %s561_s14 }
  0xec   : > { %p668_p7 = pnand %p671_p6, %p913_p8 }
  0xee   : > { %p669_p9 = pneg %p668_p7 }
  0xf0   : > { %811 = dma.done.wait (%p669_p9), %s562_s21, 512  }
  0xf1   : > { %813 = vsyncadd (%p669_p9), %s562_s21, 4294966784  ;;  %s17_s20 = sadd.s32 1, %s836_s20   ;;  %s1130_s15 = smov %s820_s16 }
  0xf2   : > { %p14_p10 = scmp.ge.s32.totalorder %s17_s20, 4   ;;  %s1131_s16 = smov %s824_s17 }
  0xf3   : > { %s1132_s17 = smov %s919_s28  ;;  %s1133_s18 = smov %s832_s19 }
  0xf4   : > { %s1134_s19 = smov %s1136_s23  ;;  %16 = sbr.rel (!%p14_p10) target bundleno = 4 (0x4), region = 71 }
  0xf9   :  { %568 = vsyncpa [#allocation3], 1 }
  0xfa   :  { %570 = vsyncpa [#allocation3 + $0x1], 1 }

</bundles_post_ra>
